<compile_context>
chip_gen: v6e
topology: v6e:2x2x1
jax: 0.10.0
libtpu: 0.0.40
codegen_flags: <defaults>
</compile_context>

<pallas_src>
import functools
import math
import numpy as np
import jax
import jax.numpy as jnp
from jax import lax
from jax.experimental import pallas as pl
from jax.experimental.pallas import tpu as pltpu


# ROIs are packed so the matmul N-dim / store lane-dim is >= this.
# TODO(synk): bump to 256 on v6e/v7x (256-wide MXU) after re-checking the VMEM budget.
_LANE_TARGET = 128


def _pair(x):
    return tuple(x) if isinstance(x, (tuple, list)) else (x, x)


def _deform_psroi_pool_kernel(gbidx_ref, params_ref, data_ref, out_ref, *,
                              H, W, sample_per_part):
    """One grid step: R batch-grouped ROIs sharing one feature image.

    params_ref : (4, R*PP) f32  rows = {hstart, wstart, sub_h, sub_w}, lane j -> roi j//PP, bin j%PP
    data_ref   : (C, H*W)  bf16 feature image of this group's batch
    out_ref    : (C, R*PP)      pooled output (final dtype)
    """
    del gbidx_ref                    # only consumed by the index_maps
    S = sample_per_part
    params = params_ref[...]
    hstart = params[0:1, :]
    wstart = params[1:2, :]
    sub_h = params[2:3, :]
    sub_w = params[3:4, :]
    RPP = hstart.shape[-1]

    # pixel-coordinate columns, built once per grid step (hoisted out of the S loops)
    ys = lax.broadcasted_iota(jnp.int32, (H, 1), 0).astype(jnp.float32)
    xs = lax.broadcasted_iota(jnp.int32, (W, 1), 0).astype(jnp.float32)

    # --- separable accumulation of the bilinear "tent" weights over the S sub-samples ---
    #   w_mat[h*W+w, j] = (sum_ih wy_ih(h,j)*valid_h) * (sum_iw wx_iw(w,j)*valid_w)
    #   cnt[j]          = (sum_ih valid_h) * (sum_iw valid_w)
    Wy = jnp.zeros((H, RPP), jnp.float32)
    cnt_h = jnp.zeros((1, RPP), jnp.float32)
    for ih in range(S):
        hs = hstart + ih * sub_h
        vh = ((hs >= -0.5) & (hs <= H - 0.5)).astype(jnp.float32)   # (1, RPP)
        hc = jnp.clip(hs, 0.0, H - 1.0)
        Wy = Wy + jnp.maximum(0.0, 1.0 - jnp.abs(ys - hc)) * vh     # (H, RPP)
        cnt_h = cnt_h + vh
    Wx = jnp.zeros((W, RPP), jnp.float32)
    cnt_w = jnp.zeros((1, RPP), jnp.float32)
    for iw in range(S):
        ws = wstart + iw * sub_w
        vw = ((ws >= -0.5) & (ws <= W - 0.5)).astype(jnp.float32)   # (1, RPP)
        wc = jnp.clip(ws, 0.0, W - 1.0)
        Wx = Wx + jnp.maximum(0.0, 1.0 - jnp.abs(xs - wc)) * vw     # (W, RPP)
        cnt_w = cnt_w + vw

    # TODO(synk): for large H*W build w_mat in 8-sublane K-chunks into a VMEM scratch and
    # accumulate the dot over K tiles instead of materializing (H*W, R*PP) at once.
    w_mat = (Wy[:, None, :] * Wx[None, :, :]).reshape(H * W, RPP)   # (HW, RPP)
    cnt = cnt_h * cnt_w                                             # (1, RPP)

    feats = data_ref[...]                                           # (C, HW) bf16
    pooled = jnp.dot(feats, w_mat.astype(feats.dtype),
                     preferred_element_type=jnp.float32)            # (C, RPP) f32

    has = (cnt > 0.0).astype(jnp.float32)
    inv = pl.reciprocal(jnp.where(cnt > 0.0, cnt, 1.0), approx=True)
    out_ref[...] = (pooled * (inv * has)).astype(out_ref.dtype)


def deform_roi_pooling(data, rois, offset, spatial_scale, out_size, out_channels,
                       no_trans, group_size=1, part_size=None,
                       sample_per_part=4, trans_std=0.0):
    if isinstance(out_size, (tuple, list)):
        oh, ow = out_size
        assert oh == ow
        out_size = oh
    P = int(out_size)
    if part_size is None:
        part_size = P
    if isinstance(part_size, (tuple, list)):
        assert part_size[0] == part_size[1]
        part_size = part_size[0]
    part_size = int(part_size)
    assert 0.0 <= trans_std <= 1.0
    # TODO(synk): group_size > 1 (PS channel grouping) and class-aware offsets not implemented.
    assert group_size == 1
    B, C, H, W = data.shape
    assert C == out_channels * group_size * group_size
    N = rois.shape[0]
    PP = P * P
    HW = H * W
    S = int(sample_per_part)

    if N == 0:
        return jnp.zeros((0, out_channels, P, P), data.dtype)

    R = max(1, -(-_LANE_TARGET // PP))                    # ROIs packed per grid step
    # static upper bound on padded slot count (each non-empty batch padded to a multiple of R)
    n_slots = R * ((N + min(B, N) * (R - 1)) // R)
    n_groups = n_slots // R

    rois_f = rois.astype(jnp.float32)
    bidx = jnp.clip(rois_f[:, 0].astype(jnp.int32), 0, B - 1)

    # ---------- per-ROI geometry (exact CUDA-forward math, precomputed lane-dense) ----------
    x1, y1, x2, y2 = rois_f[:, 1], rois_f[:, 2], rois_f[:, 3], rois_f[:, 4]
    ss = jnp.float32(spatial_scale)
    # CUDA round() == floor(x + 0.5) for the (non-negative) roi coords
    roi_start_w = jnp.floor(x1 + 0.5) * ss - 0.5
    roi_start_h = jnp.floor(y1 + 0.5) * ss - 0.5
    roi_end_w = (jnp.floor(x2 + 0.5) + 1.0) * ss - 0.5
    roi_end_h = (jnp.floor(y2 + 0.5) + 1.0) * ss - 0.5
    roi_w = jnp.maximum(roi_end_w - roi_start_w, 0.1)
    roi_h = jnp.maximum(roi_end_h - roi_start_h, 0.1)
    bin_w = roi_w / P
    bin_h = roi_h / P
    sub_w = bin_w / S
    sub_h = bin_h / S

    if no_trans:
        tx = jnp.zeros((N, PP), jnp.float32)
        ty = jnp.zeros((N, PP), jnp.float32)
    else:
        assert offset.shape == (N, 2, part_size, part_size)
        # part_h/part_w per output bin are compile-time constants
        p_idx = np.floor(np.arange(P) / P * part_size).astype(np.int32)
        trans = offset.astype(jnp.float32)[:, :, p_idx][:, :, :, p_idx] * float(trans_std)
        trans = trans.reshape(N, 2, PP)
        tx = trans[:, 0, :]
        ty = trans[:, 1, :]

    ph_f = jnp.asarray(np.repeat(np.arange(P), P), jnp.float32)     # bin = ph*P + pw
    pw_f = jnp.asarray(np.tile(np.arange(P), P), jnp.float32)
    hstart = ph_f[None, :] * bin_h[:, None] + roi_start_h[:, None] + ty * roi_h[:, None]
    wstart = pw_f[None, :] * bin_w[:, None] + roi_start_w[:, None] + tx * roi_w[:, None]
    params = jnp.stack(
        [hstart, wstart,
         jnp.broadcast_to(sub_h[:, None], (N, PP)),
         jnp.broadcast_to(sub_w[:, None], (N, PP))], axis=1)        # (N, 4, PP)

    # ---------- batch-group the ROIs so every packed group shares one feature image ----------
    order = jnp.argsort(bidx)                                       # stable
    bidx_sorted = bidx[order]
    counts = jnp.bincount(bidx, length=B)                           # (B,)
    group_counts = (counts + R - 1) // R                            # groups per batch
    batch_base = jnp.concatenate(
        [jnp.zeros((1,), counts.dtype), jnp.cumsum(group_counts[:-1])]) * R
    cum_counts = jnp.concatenate(
        [jnp.zeros((1,), counts.dtype), jnp.cumsum(counts[:-1])])
    within_rank = jnp.arange(N, dtype=counts.dtype) - cum_counts[bidx_sorted]
    slot_sorted = batch_base[bidx_sorted] + within_rank
    slot_of = jnp.zeros((N,), counts.dtype).at[order].set(slot_sorted)   # roi -> slot

    # padded slots: out-of-range starts -> every sample invalid -> count 0 -> output 0
    fill = jnp.concatenate(
        [jnp.full((n_slots, 2, PP), -1e4, jnp.float32),
         jnp.zeros((n_slots, 2, PP), jnp.float32)], axis=1)
    params_slots = fill.at[slot_of].set(params)                     # (n_slots, 4, PP)
    params_g = (params_slots.reshape(n_groups, R, 4, PP)
                .transpose(0, 2, 1, 3)
                .reshape(n_groups, 4, R * PP))                      # lane-dense per group

    cum_groups = jnp.cumsum(group_counts)
    gbidx = jnp.searchsorted(cum_groups, jnp.arange(n_groups), side='right')
    gbidx = jnp.minimum(gbidx, B - 1).astype(jnp.int32)             # per-group batch id

    data_bf = data.astype(jnp.bfloat16).reshape(B, C, HW)

    kernel = functools.partial(_deform_psroi_pool_kernel, H=H, W=W, sample_per_part=S)

    grid_spec = pltpu.PrefetchScalarGridSpec(
        num_scalar_prefetch=1,                                      # gbidx -> SMEM
        grid=(n_groups,),
        in_specs=[
            # per-group geometry params
            pl.BlockSpec((pl.Squeezed(), 4, R * PP), lambda g, gb: (g, 0, 0)),
            # per-group feature image, indexed by the prefetched batch id; consecutive groups
            # with the same batch id reuse the already-resident block (ROIs are batch-grouped)
            pl.BlockSpec((pl.Squeezed(), C, HW), lambda g, gb: (gb[g], 0, 0)),
        ],
        out_specs=pl.BlockSpec((pl.Squeezed(), out_channels, R * PP),
                               lambda g, gb: (g, 0, 0)),
    )
    cost = pl.CostEstimate(
        flops=2 * n_groups * C * HW * R * PP,
        transcendentals=0,
        bytes_accessed=n_groups * (C * HW * 2 + 4 * R * PP * 4
                                   + out_channels * R * PP * data.dtype.itemsize))

    out_packed = pl.pallas_call(
        kernel,
        grid_spec=grid_spec,
        out_shape=jax.ShapeDtypeStruct((n_groups, out_channels, R * PP), data.dtype),
        compiler_params=pltpu.CompilerParams(dimension_semantics=("arbitrary",)),
        cost_estimate=cost,
    )(gbidx, params_g, data_bf)

    out_slots = (out_packed.reshape(n_groups, out_channels, R, PP)
                 .transpose(0, 2, 1, 3)
                 .reshape(n_slots, out_channels, PP))
    out = out_slots[slot_of].reshape(N, out_channels, P, P)         # unsort to roi order
    return out.astype(data.dtype)


class DeformRoIPooling3D:
    """Mirror of the PyTorch DeformRoIPooling3D module (forward only)."""

    def __init__(self, spatial_scale, out_size, out_channels, no_trans,
                 group_size=1, part_size=None, sample_per_part=4, trans_std=0.0):
        self.spatial_scale = spatial_scale
        self.out_size = _pair(out_size)
        self.out_channels = out_channels
        self.no_trans = no_trans
        self.group_size = group_size
        self.part_size = out_size if part_size is None else part_size
        self.sample_per_part = sample_per_part
        self.trans_std = trans_std

    def __call__(self, data, rois, offset):
        if self.no_trans:
            offset = jnp.zeros((0,), jnp.float32)
        return deform_roi_pooling(
            data, rois, offset, self.spatial_scale, self.out_size, self.out_channels,
            self.no_trans, self.group_size, self.part_size, self.sample_per_part,
            self.trans_std)


class DeformRoIPoolingPack3D(DeformRoIPooling3D):
    """Mirror of the PyTorch DeformRoIPoolingPack3D module (forward only)."""

    def __init__(self, spatial_scale, out_size, out_channels, no_trans,
                 group_size=1, part_size=None, sample_per_part=4, trans_std=0.0,
                 num_offset_fcs=3, deform_fc_channels=1024, rng_key=None):
        super().__init__(spatial_scale, out_size, out_channels, no_trans,
                         group_size, part_size, sample_per_part, trans_std)
        self.num_offset_fcs = num_offset_fcs
        self.deform_fc_channels = deform_fc_channels
        self.fc_params = []
        if not no_trans:
            key = jax.random.PRNGKey(0) if rng_key is None else rng_key
            ic = self.out_size[0] * self.out_size[1] * self.out_channels
            for i in range(num_offset_fcs):
                if i < num_offset_fcs - 1:
                    oc = deform_fc_channels
                    key, kw, kb = jax.random.split(key, 3)
                    bound = 1.0 / math.sqrt(ic)
                    w = jax.random.uniform(kw, (oc, ic), jnp.float32, -bound, bound)
                    b = jax.random.uniform(kb, (oc,), jnp.float32, -bound, bound)
                else:
                    oc = self.out_size[0] * self.out_size[1] * 2
                    w = jnp.zeros((oc, ic), jnp.float32)   # last layer zero-init (as in PyTorch)
                    b = jnp.zeros((oc,), jnp.float32)
                self.fc_params.append((w, b))
                ic = oc

    def _offset_fc(self, x):
        h = x
        for i, (w, b) in enumerate(self.fc_params):
            h = h @ w.T + b
            if i < len(self.fc_params) - 1:
                h = jnp.maximum(h, 0.0)
        return h

    def __call__(self, data, rois):
        assert data.shape[1] == self.out_channels
        n = rois.shape[0]
        if n == 0:
            return jnp.zeros((0, self.out_channels, self.out_size[0], self.out_size[1]),
                             data.dtype)
        if self.no_trans:
            offset = jnp.zeros((0,), jnp.float32)
            return deform_roi_pooling(
                data, rois, offset, self.spatial_scale, self.out_size, self.out_channels,
                self.no_trans, self.group_size, self.part_size, self.sample_per_part,
                self.trans_std)
        # pass 1: plain pooling (no_trans=True) to predict the offsets
        offset = jnp.zeros((0,), jnp.float32)
        x = deform_roi_pooling(
            data, rois, offset, self.spatial_scale, self.out_size, self.out_channels,
            True, self.group_size, self.part_size, self.sample_per_part, self.trans_std)
        offset = self._offset_fc(x.reshape(n, -1))
        offset = offset.reshape(n, 2, self.out_size[0], self.out_size[1])
        # pass 2: deformable pooling with the predicted offsets
        return deform_roi_pooling(
            data, rois, offset, self.spatial_scale, self.out_size, self.out_channels,
            self.no_trans, self.group_size, self.part_size, self.sample_per_part,
            self.trans_std)


def _reference_deform_roi_pooling(data, rois, offset, spatial_scale, out_size,
                                  sample_per_part, trans_std, no_trans):
    """Pure numpy port of the CUDA forward (float64), for a loose numeric self-check."""
    data = np.asarray(data, np.float64)
    rois = np.asarray(rois, np.float64)
    if not no_trans:
        offset = np.asarray(offset, np.float64)
    B, C, H, W = data.shape
    P = out_size
    S = sample_per_part
    N = rois.shape[0]
    out = np.zeros((N, C, P, P), np.float64)
    for n in range(N):
        b = int(rois[n, 0])
        x1, y1, x2, y2 = rois[n, 1:5]
        rsw = math.floor(x1 + 0.5) * spatial_scale - 0.5
        rsh = math.floor(y1 + 0.5) * spatial_scale - 0.5
        rew = (math.floor(x2 + 0.5) + 1.0) * spatial_scale - 0.5
        reh = (math.floor(y2 + 0.5) + 1.0) * spatial_scale - 0.5
        rw = max(rew - rsw, 0.1)
        rh = max(reh - rsh, 0.1)
        bw, bh = rw / P, rh / P
        sw, sh = bw / S, bh / S
        for ph in range(P):
            for pw in range(P):
                if no_trans:
                    tx = ty = 0.0
                else:
                    part_h = int(math.floor(ph / P * P))
                    part_w = int(math.floor(pw / P * P))
                    tx = offset[n, 0, part_h, part_w] * trans_std
                    ty = offset[n, 1, part_h, part_w] * trans_std
                ws0 = pw * bw + rsw + tx * rw
                hs0 = ph * bh + rsh + ty * rh
                s = np.zeros(C, np.float64)
                cnt = 0
                for ih in range(S):
                    for iw in range(S):
                        w = ws0 + iw * sw
                        h = hs0 + ih * sh
                        if w < -0.5 or w > W - 0.5 or h < -0.5 or h > H - 0.5:
                            continue
                        w = min(max(w, 0.0), W - 1.0)
                        h = min(max(h, 0.0), H - 1.0)
                        h0, w0 = int(math.floor(h)), int(math.floor(w))
                        h1, w1 = min(h0 + 1, H - 1), min(w0 + 1, W - 1)
                        lh, lw = h - h0, w - w0
                        val = (data[b, :, h0, w0] * (1 - lh) * (1 - lw)
                               + data[b, :, h0, w1] * (1 - lh) * lw
                               + data[b, :, h1, w0] * lh * (1 - lw)
                               + data[b, :, h1, w1] * lh * lw)
                        s += val
                        cnt += 1
                if cnt > 0:
                    out[n, :, ph, pw] = s / cnt
    return out


if __name__ == "__main__":
    key = jax.random.PRNGKey(0)
    B, C, H, W = 2, 4, 16, 16
    N_ROIS = 6
    OUT_SIZE = 4
    OUT_CHANNELS = C          # group_size == 1 -> in channels == out channels
    SPATIAL_SCALE = 0.5
    SAMPLE_PER_PART = 4
    TRANS_STD = 0.1

    k1, k2, k3, k4, k5 = jax.random.split(key, 5)
    data = jax.random.normal(k1, (B, C, H, W), jnp.float32)
    batch_idx = jax.random.randint(k2, (N_ROIS, 1), 0, B).astype(jnp.float32)
    xy1 = jax.random.uniform(k3, (N_ROIS, 2), minval=0.0, maxval=18.0)
    wh = jax.random.uniform(k4, (N_ROIS, 2), minval=4.0, maxval=14.0)
    rois = jnp.concatenate([batch_idx, xy1, xy1 + wh], axis=1)          # (N, 5)

    # exercise the base op with explicit (non-zero) offsets and check against a numpy reference
    offset = 0.2 * jax.random.normal(k5, (N_ROIS, 2, OUT_SIZE, OUT_SIZE), jnp.float32)
    base = DeformRoIPooling3D(SPATIAL_SCALE, OUT_SIZE, OUT_CHANNELS, no_trans=False,
                              group_size=1, part_size=None,
                              sample_per_part=SAMPLE_PER_PART, trans_std=TRANS_STD)
    out_base = base(data, rois, offset)
    jax.block_until_ready(out_base)
    assert out_base.shape == (N_ROIS, OUT_CHANNELS, OUT_SIZE, OUT_SIZE)
    assert bool(jnp.all(jnp.isfinite(out_base)))

    ref = _reference_deform_roi_pooling(data, rois, offset, SPATIAL_SCALE, OUT_SIZE,
                                        SAMPLE_PER_PART, TRANS_STD, no_trans=False)
    err = np.abs(np.asarray(out_base, np.float64) - ref)
    assert float(err.mean()) < 2e-2, f"mean abs err {float(err.mean()):.4f}"   # bf16 MXU tolerance

    # full Pack3D module: pool -> offset_fc MLP -> deformable pool
    pool = DeformRoIPoolingPack3D(SPATIAL_SCALE, OUT_SIZE, OUT_CHANNELS, no_trans=False,
                                  group_size=1, part_size=None,
                                  sample_per_part=SAMPLE_PER_PART, trans_std=TRANS_STD,
                                  num_offset_fcs=3, deform_fc_channels=64)
    out = pool(data, rois)
    jax.block_until_ready(out)
    assert out.shape == (N_ROIS, OUT_CHANNELS, OUT_SIZE, OUT_SIZE)
    assert bool(jnp.all(jnp.isfinite(out)))
    print("KERNEL_OK")
</pallas_src>

<mosaic_0001>
module attributes {stable_mosaic.version = 11 : i64} {
  func.func @_deform_psroi_pool_kernel(%arg0: i32, %arg1: memref<2xi32, #tpu.memory_space<smem>>, %arg2: memref<1x4x128xf32, #tpu.memory_space<vmem>>, %arg3: memref<1x4x256xbf16, #tpu.memory_space<vmem>>, %arg4: memref<1x4x128xf32, #tpu.memory_space<vmem>>) attributes {dimension_semantics = [#tpu.dimension_semantics<arbitrary>], iteration_bounds = array<i64: 2>, scalar_prefetch = 1 : i64, scratch_operands = 0 : i64, tpu.core_type = #tpu.core_type<tc>, window_params = [{transform_indices = @transform_0, window_bounds = array<i64: 1, 4, 128>}, {transform_indices = @transform_1, window_bounds = array<i64: 1, 4, 256>}, {transform_indices = @transform_2, window_bounds = array<i64: 1, 4, 128>}]} {
    %c0 = arith.constant 0 : index
    %c0_0 = arith.constant 0 : index
    %c0_1 = arith.constant 0 : index
    %0 = vector.load %arg2[%c0, %c0_0, %c0_1] : memref<1x4x128xf32, #tpu.memory_space<vmem>>, vector<1x4x128xf32>
    %1 = vector.shape_cast %0 : vector<1x4x128xf32> to vector<4x128xf32>
    %2 = vector.extract_strided_slice %1 {offsets = [0, 0], sizes = [1, 128], strides = [1, 1]} : vector<4x128xf32> to vector<1x128xf32>
    %3 = vector.extract_strided_slice %1 {offsets = [1, 0], sizes = [1, 128], strides = [1, 1]} : vector<4x128xf32> to vector<1x128xf32>
    %4 = vector.extract_strided_slice %1 {offsets = [2, 0], sizes = [1, 128], strides = [1, 1]} : vector<4x128xf32> to vector<1x128xf32>
    %5 = vector.extract_strided_slice %1 {offsets = [3, 0], sizes = [1, 128], strides = [1, 1]} : vector<4x128xf32> to vector<1x128xf32>
    %6 = tpu.iota {dimensions = array<i32: 0>} : vector<16x1xi32>
    %7 = arith.sitofp %6 : vector<16x1xi32> to vector<16x1xf32>
    %8 = tpu.iota {dimensions = array<i32: 0>} : vector<16x1xi32>
    %9 = arith.sitofp %8 : vector<16x1xi32> to vector<16x1xf32>
    %cst = arith.constant 0.000000e+00 : f32
    %10 = vector.broadcast %cst : f32 to vector<16x128xf32>
    %cst_2 = arith.constant 0.000000e+00 : f32
    %11 = vector.broadcast %cst_2 : f32 to vector<1x128xf32>
    %cst_3 = arith.constant 0.000000e+00 : f32
    %12 = vector.broadcast %cst_3 : f32 to vector<1x128xf32>
    %13 = arith.mulf %12, %4 : vector<1x128xf32>
    %14 = arith.addf %2, %13 : vector<1x128xf32>
    %cst_4 = arith.constant -5.000000e-01 : f32
    %15 = vector.broadcast %cst_4 : f32 to vector<1x128xf32>
    %16 = arith.cmpf oge, %14, %15 : vector<1x128xf32>
    %cst_5 = arith.constant 1.550000e+01 : f32
    %17 = vector.broadcast %cst_5 : f32 to vector<1x128xf32>
    %18 = arith.cmpf ole, %14, %17 : vector<1x128xf32>
    %19 = arith.andi %16, %18 : vector<1x128xi1>
    %20 = arith.extui %19 : vector<1x128xi1> to vector<1x128xi32>
    %21 = arith.sitofp %20 : vector<1x128xi32> to vector<1x128xf32>
    %cst_6 = arith.constant 0.000000e+00 : f32
    %cst_7 = arith.constant 1.500000e+01 : f32
    %22 = vector.broadcast %cst_6 : f32 to vector<1x128xf32>
    %23 = arith.maximumf %22, %14 : vector<1x128xf32>
    %24 = vector.broadcast %cst_7 : f32 to vector<1x128xf32>
    %25 = arith.minimumf %24, %23 : vector<1x128xf32>
    %26 = vector.broadcast %7 : vector<16x1xf32> to vector<16x128xf32>
    %27 = vector.broadcast %25 : vector<1x128xf32> to vector<16x128xf32>
    %28 = arith.subf %26, %27 : vector<16x128xf32>
    %29 = math.absf %28 : vector<16x128xf32>
    %cst_8 = arith.constant 1.000000e+00 : f32
    %30 = vector.broadcast %cst_8 : f32 to vector<16x128xf32>
    %31 = arith.subf %30, %29 : vector<16x128xf32>
    %cst_9 = arith.constant 0.000000e+00 : f32
    %32 = vector.broadcast %cst_9 : f32 to vector<16x128xf32>
    %33 = arith.maximumf %32, %31 : vector<16x128xf32>
    %34 = vector.broadcast %21 : vector<1x128xf32> to vector<16x128xf32>
    %35 = arith.mulf %33, %34 : vector<16x128xf32>
    %36 = arith.addf %10, %35 : vector<16x128xf32>
    %37 = arith.addf %11, %21 : vector<1x128xf32>
    %cst_10 = arith.constant 1.000000e+00 : f32
    %38 = vector.broadcast %cst_10 : f32 to vector<1x128xf32>
    %39 = arith.mulf %38, %4 : vector<1x128xf32>
    %40 = arith.addf %2, %39 : vector<1x128xf32>
    %cst_11 = arith.constant -5.000000e-01 : f32
    %41 = vector.broadcast %cst_11 : f32 to vector<1x128xf32>
    %42 = arith.cmpf oge, %40, %41 : vector<1x128xf32>
    %cst_12 = arith.constant 1.550000e+01 : f32
    %43 = vector.broadcast %cst_12 : f32 to vector<1x128xf32>
    %44 = arith.cmpf ole, %40, %43 : vector<1x128xf32>
    %45 = arith.andi %42, %44 : vector<1x128xi1>
    %46 = arith.extui %45 : vector<1x128xi1> to vector<1x128xi32>
    %47 = arith.sitofp %46 : vector<1x128xi32> to vector<1x128xf32>
    %cst_13 = arith.constant 0.000000e+00 : f32
    %cst_14 = arith.constant 1.500000e+01 : f32
    %48 = vector.broadcast %cst_13 : f32 to vector<1x128xf32>
    %49 = arith.maximumf %48, %40 : vector<1x128xf32>
    %50 = vector.broadcast %cst_14 : f32 to vector<1x128xf32>
    %51 = arith.minimumf %50, %49 : vector<1x128xf32>
    %52 = vector.broadcast %7 : vector<16x1xf32> to vector<16x128xf32>
    %53 = vector.broadcast %51 : vector<1x128xf32> to vector<16x128xf32>
    %54 = arith.subf %52, %53 : vector<16x128xf32>
    %55 = math.absf %54 : vector<16x128xf32>
    %cst_15 = arith.constant 1.000000e+00 : f32
    %56 = vector.broadcast %cst_15 : f32 to vector<16x128xf32>
    %57 = arith.subf %56, %55 : vector<16x128xf32>
    %cst_16 = arith.constant 0.000000e+00 : f32
    %58 = vector.broadcast %cst_16 : f32 to vector<16x128xf32>
    %59 = arith.maximumf %58, %57 : vector<16x128xf32>
    %60 = vector.broadcast %47 : vector<1x128xf32> to vector<16x128xf32>
    %61 = arith.mulf %59, %60 : vector<16x128xf32>
    %62 = arith.addf %36, %61 : vector<16x128xf32>
    %63 = arith.addf %37, %47 : vector<1x128xf32>
    %cst_17 = arith.constant 2.000000e+00 : f32
    %64 = vector.broadcast %cst_17 : f32 to vector<1x128xf32>
    %65 = arith.mulf %64, %4 : vector<1x128xf32>
    %66 = arith.addf %2, %65 : vector<1x128xf32>
    %cst_18 = arith.constant -5.000000e-01 : f32
    %67 = vector.broadcast %cst_18 : f32 to vector<1x128xf32>
    %68 = arith.cmpf oge, %66, %67 : vector<1x128xf32>
    %cst_19 = arith.constant 1.550000e+01 : f32
    %69 = vector.broadcast %cst_19 : f32 to vector<1x128xf32>
    %70 = arith.cmpf ole, %66, %69 : vector<1x128xf32>
    %71 = arith.andi %68, %70 : vector<1x128xi1>
    %72 = arith.extui %71 : vector<1x128xi1> to vector<1x128xi32>
    %73 = arith.sitofp %72 : vector<1x128xi32> to vector<1x128xf32>
    %cst_20 = arith.constant 0.000000e+00 : f32
    %cst_21 = arith.constant 1.500000e+01 : f32
    %74 = vector.broadcast %cst_20 : f32 to vector<1x128xf32>
    %75 = arith.maximumf %74, %66 : vector<1x128xf32>
    %76 = vector.broadcast %cst_21 : f32 to vector<1x128xf32>
    %77 = arith.minimumf %76, %75 : vector<1x128xf32>
    %78 = vector.broadcast %7 : vector<16x1xf32> to vector<16x128xf32>
    %79 = vector.broadcast %77 : vector<1x128xf32> to vector<16x128xf32>
    %80 = arith.subf %78, %79 : vector<16x128xf32>
    %81 = math.absf %80 : vector<16x128xf32>
    %cst_22 = arith.constant 1.000000e+00 : f32
    %82 = vector.broadcast %cst_22 : f32 to vector<16x128xf32>
    %83 = arith.subf %82, %81 : vector<16x128xf32>
    %cst_23 = arith.constant 0.000000e+00 : f32
    %84 = vector.broadcast %cst_23 : f32 to vector<16x128xf32>
    %85 = arith.maximumf %84, %83 : vector<16x128xf32>
    %86 = vector.broadcast %73 : vector<1x128xf32> to vector<16x128xf32>
    %87 = arith.mulf %85, %86 : vector<16x128xf32>
    %88 = arith.addf %62, %87 : vector<16x128xf32>
    %89 = arith.addf %63, %73 : vector<1x128xf32>
    %cst_24 = arith.constant 3.000000e+00 : f32
    %90 = vector.broadcast %cst_24 : f32 to vector<1x128xf32>
    %91 = arith.mulf %90, %4 : vector<1x128xf32>
    %92 = arith.addf %2, %91 : vector<1x128xf32>
    %cst_25 = arith.constant -5.000000e-01 : f32
    %93 = vector.broadcast %cst_25 : f32 to vector<1x128xf32>
    %94 = arith.cmpf oge, %92, %93 : vector<1x128xf32>
    %cst_26 = arith.constant 1.550000e+01 : f32
    %95 = vector.broadcast %cst_26 : f32 to vector<1x128xf32>
    %96 = arith.cmpf ole, %92, %95 : vector<1x128xf32>
    %97 = arith.andi %94, %96 : vector<1x128xi1>
    %98 = arith.extui %97 : vector<1x128xi1> to vector<1x128xi32>
    %99 = arith.sitofp %98 : vector<1x128xi32> to vector<1x128xf32>
    %cst_27 = arith.constant 0.000000e+00 : f32
    %cst_28 = arith.constant 1.500000e+01 : f32
    %100 = vector.broadcast %cst_27 : f32 to vector<1x128xf32>
    %101 = arith.maximumf %100, %92 : vector<1x128xf32>
    %102 = vector.broadcast %cst_28 : f32 to vector<1x128xf32>
    %103 = arith.minimumf %102, %101 : vector<1x128xf32>
    %104 = vector.broadcast %7 : vector<16x1xf32> to vector<16x128xf32>
    %105 = vector.broadcast %103 : vector<1x128xf32> to vector<16x128xf32>
    %106 = arith.subf %104, %105 : vector<16x128xf32>
    %107 = math.absf %106 : vector<16x128xf32>
    %cst_29 = arith.constant 1.000000e+00 : f32
    %108 = vector.broadcast %cst_29 : f32 to vector<16x128xf32>
    %109 = arith.subf %108, %107 : vector<16x128xf32>
    %cst_30 = arith.constant 0.000000e+00 : f32
    %110 = vector.broadcast %cst_30 : f32 to vector<16x128xf32>
    %111 = arith.maximumf %110, %109 : vector<16x128xf32>
    %112 = vector.broadcast %99 : vector<1x128xf32> to vector<16x128xf32>
    %113 = arith.mulf %111, %112 : vector<16x128xf32>
    %114 = arith.addf %88, %113 : vector<16x128xf32>
    %115 = arith.addf %89, %99 : vector<1x128xf32>
    %cst_31 = arith.constant 0.000000e+00 : f32
    %116 = vector.broadcast %cst_31 : f32 to vector<16x128xf32>
    %cst_32 = arith.constant 0.000000e+00 : f32
    %117 = vector.broadcast %cst_32 : f32 to vector<1x128xf32>
    %cst_33 = arith.constant 0.000000e+00 : f32
    %118 = vector.broadcast %cst_33 : f32 to vector<1x128xf32>
    %119 = arith.mulf %118, %5 : vector<1x128xf32>
    %120 = arith.addf %3, %119 : vector<1x128xf32>
    %cst_34 = arith.constant -5.000000e-01 : f32
    %121 = vector.broadcast %cst_34 : f32 to vector<1x128xf32>
    %122 = arith.cmpf oge, %120, %121 : vector<1x128xf32>
    %cst_35 = arith.constant 1.550000e+01 : f32
    %123 = vector.broadcast %cst_35 : f32 to vector<1x128xf32>
    %124 = arith.cmpf ole, %120, %123 : vector<1x128xf32>
    %125 = arith.andi %122, %124 : vector<1x128xi1>
    %126 = arith.extui %125 : vector<1x128xi1> to vector<1x128xi32>
    %127 = arith.sitofp %126 : vector<1x128xi32> to vector<1x128xf32>
    %cst_36 = arith.constant 0.000000e+00 : f32
    %cst_37 = arith.constant 1.500000e+01 : f32
    %128 = vector.broadcast %cst_36 : f32 to vector<1x128xf32>
    %129 = arith.maximumf %128, %120 : vector<1x128xf32>
    %130 = vector.broadcast %cst_37 : f32 to vector<1x128xf32>
    %131 = arith.minimumf %130, %129 : vector<1x128xf32>
    %132 = vector.broadcast %9 : vector<16x1xf32> to vector<16x128xf32>
    %133 = vector.broadcast %131 : vector<1x128xf32> to vector<16x128xf32>
    %134 = arith.subf %132, %133 : vector<16x128xf32>
    %135 = math.absf %134 : vector<16x128xf32>
    %cst_38 = arith.constant 1.000000e+00 : f32
    %136 = vector.broadcast %cst_38 : f32 to vector<16x128xf32>
    %137 = arith.subf %136, %135 : vector<16x128xf32>
    %cst_39 = arith.constant 0.000000e+00 : f32
    %138 = vector.broadcast %cst_39 : f32 to vector<16x128xf32>
    %139 = arith.maximumf %138, %137 : vector<16x128xf32>
    %140 = vector.broadcast %127 : vector<1x128xf32> to vector<16x128xf32>
    %141 = arith.mulf %139, %140 : vector<16x128xf32>
    %142 = arith.addf %116, %141 : vector<16x128xf32>
    %143 = arith.addf %117, %127 : vector<1x128xf32>
    %cst_40 = arith.constant 1.000000e+00 : f32
    %144 = vector.broadcast %cst_40 : f32 to vector<1x128xf32>
    %145 = arith.mulf %144, %5 : vector<1x128xf32>
    %146 = arith.addf %3, %145 : vector<1x128xf32>
    %cst_41 = arith.constant -5.000000e-01 : f32
    %147 = vector.broadcast %cst_41 : f32 to vector<1x128xf32>
    %148 = arith.cmpf oge, %146, %147 : vector<1x128xf32>
    %cst_42 = arith.constant 1.550000e+01 : f32
    %149 = vector.broadcast %cst_42 : f32 to vector<1x128xf32>
    %150 = arith.cmpf ole, %146, %149 : vector<1x128xf32>
    %151 = arith.andi %148, %150 : vector<1x128xi1>
    %152 = arith.extui %151 : vector<1x128xi1> to vector<1x128xi32>
    %153 = arith.sitofp %152 : vector<1x128xi32> to vector<1x128xf32>
    %cst_43 = arith.constant 0.000000e+00 : f32
    %cst_44 = arith.constant 1.500000e+01 : f32
    %154 = vector.broadcast %cst_43 : f32 to vector<1x128xf32>
    %155 = arith.maximumf %154, %146 : vector<1x128xf32>
    %156 = vector.broadcast %cst_44 : f32 to vector<1x128xf32>
    %157 = arith.minimumf %156, %155 : vector<1x128xf32>
    %158 = vector.broadcast %9 : vector<16x1xf32> to vector<16x128xf32>
    %159 = vector.broadcast %157 : vector<1x128xf32> to vector<16x128xf32>
    %160 = arith.subf %158, %159 : vector<16x128xf32>
    %161 = math.absf %160 : vector<16x128xf32>
    %cst_45 = arith.constant 1.000000e+00 : f32
    %162 = vector.broadcast %cst_45 : f32 to vector<16x128xf32>
    %163 = arith.subf %162, %161 : vector<16x128xf32>
    %cst_46 = arith.constant 0.000000e+00 : f32
    %164 = vector.broadcast %cst_46 : f32 to vector<16x128xf32>
    %165 = arith.maximumf %164, %163 : vector<16x128xf32>
    %166 = vector.broadcast %153 : vector<1x128xf32> to vector<16x128xf32>
    %167 = arith.mulf %165, %166 : vector<16x128xf32>
    %168 = arith.addf %142, %167 : vector<16x128xf32>
    %169 = arith.addf %143, %153 : vector<1x128xf32>
    %cst_47 = arith.constant 2.000000e+00 : f32
    %170 = vector.broadcast %cst_47 : f32 to vector<1x128xf32>
    %171 = arith.mulf %170, %5 : vector<1x128xf32>
    %172 = arith.addf %3, %171 : vector<1x128xf32>
    %cst_48 = arith.constant -5.000000e-01 : f32
    %173 = vector.broadcast %cst_48 : f32 to vector<1x128xf32>
    %174 = arith.cmpf oge, %172, %173 : vector<1x128xf32>
    %cst_49 = arith.constant 1.550000e+01 : f32
    %175 = vector.broadcast %cst_49 : f32 to vector<1x128xf32>
    %176 = arith.cmpf ole, %172, %175 : vector<1x128xf32>
    %177 = arith.andi %174, %176 : vector<1x128xi1>
    %178 = arith.extui %177 : vector<1x128xi1> to vector<1x128xi32>
    %179 = arith.sitofp %178 : vector<1x128xi32> to vector<1x128xf32>
    %cst_50 = arith.constant 0.000000e+00 : f32
    %cst_51 = arith.constant 1.500000e+01 : f32
    %180 = vector.broadcast %cst_50 : f32 to vector<1x128xf32>
    %181 = arith.maximumf %180, %172 : vector<1x128xf32>
    %182 = vector.broadcast %cst_51 : f32 to vector<1x128xf32>
    %183 = arith.minimumf %182, %181 : vector<1x128xf32>
    %184 = vector.broadcast %9 : vector<16x1xf32> to vector<16x128xf32>
    %185 = vector.broadcast %183 : vector<1x128xf32> to vector<16x128xf32>
    %186 = arith.subf %184, %185 : vector<16x128xf32>
    %187 = math.absf %186 : vector<16x128xf32>
    %cst_52 = arith.constant 1.000000e+00 : f32
    %188 = vector.broadcast %cst_52 : f32 to vector<16x128xf32>
    %189 = arith.subf %188, %187 : vector<16x128xf32>
    %cst_53 = arith.constant 0.000000e+00 : f32
    %190 = vector.broadcast %cst_53 : f32 to vector<16x128xf32>
    %191 = arith.maximumf %190, %189 : vector<16x128xf32>
    %192 = vector.broadcast %179 : vector<1x128xf32> to vector<16x128xf32>
    %193 = arith.mulf %191, %192 : vector<16x128xf32>
    %194 = arith.addf %168, %193 : vector<16x128xf32>
    %195 = arith.addf %169, %179 : vector<1x128xf32>
    %cst_54 = arith.constant 3.000000e+00 : f32
    %196 = vector.broadcast %cst_54 : f32 to vector<1x128xf32>
    %197 = arith.mulf %196, %5 : vector<1x128xf32>
    %198 = arith.addf %3, %197 : vector<1x128xf32>
    %cst_55 = arith.constant -5.000000e-01 : f32
    %199 = vector.broadcast %cst_55 : f32 to vector<1x128xf32>
    %200 = arith.cmpf oge, %198, %199 : vector<1x128xf32>
    %cst_56 = arith.constant 1.550000e+01 : f32
    %201 = vector.broadcast %cst_56 : f32 to vector<1x128xf32>
    %202 = arith.cmpf ole, %198, %201 : vector<1x128xf32>
    %203 = arith.andi %200, %202 : vector<1x128xi1>
    %204 = arith.extui %203 : vector<1x128xi1> to vector<1x128xi32>
    %205 = arith.sitofp %204 : vector<1x128xi32> to vector<1x128xf32>
    %cst_57 = arith.constant 0.000000e+00 : f32
    %cst_58 = arith.constant 1.500000e+01 : f32
    %206 = vector.broadcast %cst_57 : f32 to vector<1x128xf32>
    %207 = arith.maximumf %206, %198 : vector<1x128xf32>
    %208 = vector.broadcast %cst_58 : f32 to vector<1x128xf32>
    %209 = arith.minimumf %208, %207 : vector<1x128xf32>
    %210 = vector.broadcast %9 : vector<16x1xf32> to vector<16x128xf32>
    %211 = vector.broadcast %209 : vector<1x128xf32> to vector<16x128xf32>
    %212 = arith.subf %210, %211 : vector<16x128xf32>
    %213 = math.absf %212 : vector<16x128xf32>
    %cst_59 = arith.constant 1.000000e+00 : f32
    %214 = vector.broadcast %cst_59 : f32 to vector<16x128xf32>
    %215 = arith.subf %214, %213 : vector<16x128xf32>
    %cst_60 = arith.constant 0.000000e+00 : f32
    %216 = vector.broadcast %cst_60 : f32 to vector<16x128xf32>
    %217 = arith.maximumf %216, %215 : vector<16x128xf32>
    %218 = vector.broadcast %205 : vector<1x128xf32> to vector<16x128xf32>
    %219 = arith.mulf %217, %218 : vector<16x128xf32>
    %220 = arith.addf %194, %219 : vector<16x128xf32>
    %221 = arith.addf %195, %205 : vector<1x128xf32>
    %222 = vector.shape_cast %114 : vector<16x128xf32> to vector<16x1x128xf32>
    %223 = vector.shape_cast %220 : vector<16x128xf32> to vector<1x16x128xf32>
    %224 = vector.broadcast %222 : vector<16x1x128xf32> to vector<16x16x128xf32>
    %225 = vector.broadcast %223 : vector<1x16x128xf32> to vector<16x16x128xf32>
    %226 = arith.mulf %224, %225 : vector<16x16x128xf32>
    %227 = vector.shape_cast %226 : vector<16x16x128xf32> to vector<256x128xf32>
    %228 = arith.mulf %115, %221 : vector<1x128xf32>
    %c0_61 = arith.constant 0 : index
    %c0_62 = arith.constant 0 : index
    %c0_63 = arith.constant 0 : index
    %229 = vector.load %arg3[%c0_61, %c0_62, %c0_63] : memref<1x4x256xbf16, #tpu.memory_space<vmem>>, vector<1x4x256xbf16>
    %230 = vector.shape_cast %229 : vector<1x4x256xbf16> to vector<4x256xbf16>
    %231 = arith.truncf %227 : vector<256x128xf32> to vector<256x128xbf16>
    %cst_64 = arith.constant dense<0.000000e+00> : vector<4x128xf32>
    %232 = tpu.matmul %230, %231, %cst_64 {dimension_numbers = #tpu.dot_dimension_numbers<[1], [0], [0], [1], [0, 0, 1, 1], [], []>} : vector<4x256xbf16>, vector<256x128xbf16>, vector<4x128xf32> -> vector<4x128xf32>
    %cst_65 = arith.constant 0.000000e+00 : f32
    %233 = vector.broadcast %cst_65 : f32 to vector<1x128xf32>
    %234 = arith.cmpf ogt, %228, %233 : vector<1x128xf32>
    %235 = arith.extui %234 : vector<1x128xi1> to vector<1x128xi32>
    %236 = arith.sitofp %235 : vector<1x128xi32> to vector<1x128xf32>
    %cst_66 = arith.constant 0.000000e+00 : f32
    %237 = vector.broadcast %cst_66 : f32 to vector<1x128xf32>
    %238 = arith.cmpf ogt, %228, %237 : vector<1x128xf32>
    %cst_67 = arith.constant 1.000000e+00 : f32
    %239 = vector.broadcast %cst_67 : f32 to vector<1x128xf32>
    %240 = arith.select %238, %228, %239 : vector<1x128xi1>, vector<1x128xf32>
    %241 = tpu.reciprocal %240 {approx = true} : vector<1x128xf32> -> vector<1x128xf32>
    %242 = arith.mulf %241, %236 : vector<1x128xf32>
    %243 = vector.broadcast %242 : vector<1x128xf32> to vector<4x128xf32>
    %244 = arith.mulf %232, %243 : vector<4x128xf32>
    %c0_68 = arith.constant 0 : index
    %c0_69 = arith.constant 0 : index
    %c0_70 = arith.constant 0 : index
    %245 = vector.load %arg4[%c0_68, %c0_69, %c0_70] : memref<1x4x128xf32, #tpu.memory_space<vmem>>, vector<1x4x128xf32>
    %246 = vector.shape_cast %245 : vector<1x4x128xf32> to vector<4x128xf32>
    %247 = vector.shape_cast %244 : vector<4x128xf32> to vector<1x4x128xf32>
    tpu.vector_store %arg4[%c0_68, %c0_69, %c0_70], %247 {strides = array<i32>} : memref<1x4x128xf32, #tpu.memory_space<vmem>>, vector<1x4x128xf32>,
    return
  }
  func.func @transform_0(%arg0: i32, %arg1: memref<2xi32, #tpu.memory_space<smem>>) -> (i32, i32, i32) {
    %c0_i32 = arith.constant 0 : i32
    %c0_i32_0 = arith.constant 0 : i32
    %c0_i32_1 = arith.constant 0 : i32
    return %arg0, %c0_i32, %c0_i32_0 : i32, i32, i32
  }
  func.func @transform_1(%arg0: i32, %arg1: memref<2xi32, #tpu.memory_space<smem>>) -> (i32, i32, i32) {
    %0 = arith.index_cast %arg0 : i32 to index
    %1 = memref.load %arg1[%0] : memref<2xi32, #tpu.memory_space<smem>>
    %c0_i32 = arith.constant 0 : i32
    %c0_i32_0 = arith.constant 0 : i32
    %c0_i32_1 = arith.constant 0 : i32
    return %1, %c0_i32, %c0_i32_0 : i32, i32, i32
  }
  func.func @transform_2(%arg0: i32, %arg1: memref<2xi32, #tpu.memory_space<smem>>) -> (i32, i32, i32) {
    %c0_i32 = arith.constant 0 : i32
    %c0_i32_0 = arith.constant 0 : i32
    %c0_i32_1 = arith.constant 0 : i32
    return %arg0, %c0_i32, %c0_i32_0 : i32, i32, i32
  }
}

</mosaic_0001>

<bundles_post_ra>
// kernel: tpu_custom_call.1
= control target key start
LH: loop header
LB: loop body
LE: loop exit
PB: predicated region body
PF: predicated region fallthrough
CT: control target
= control target key end

     0   :  { %s1116_s12 = smov [#allocation3]   ;;  %s1558_s0 = inlined_call_operand.hbm [shape: s32[2], index: 0, kind: input, shape index: {}]   ;;  %s1559_s1 = inlined_call_operand.hbm [shape: f32[2,4,128], index: 1, kind: input, shape index: {}]   ;;  %s1560_s2 = inlined_call_operand.hbm [shape: bf16[2,4,256], index: 2, kind: input, shape index: {}]   ;;  %s1561_s3 = inlined_call_operand.hbm [shape: f32[2,4,128], index: 3, kind: output, shape index: {}]  }
   0x1   :  { %1569 = sst [smem:[#allocation18_spill]] %s1559_s1 }
   0x2   :  { %9 = dma.hbm_to_smem %s1558_s0, 16, %s1116_s12, [#allocation2] }
   0x3   :  { %1074 = dma.done.wait [#allocation2], 16 }
   0x4   :  { %1075 = vsyncadd [#allocation2], 4294967280 }
   0x5   :  { %11 = sfence }
   0x6   :  { %12 = vsyncpa [#allocation5], 0 }
   0x7   :  { %14 = vsyncpa [#allocation5 + $0x1], 0 }
   0x8   :  { %15 = vsyncpa [#allocation8], 0 }
   0x9   :  { %17 = vsyncpa [#allocation8 + $0x1], 0 }
   0xa   :  { %18 = vsyncpa [#allocation6], 0 }
   0xb   :  { %20 = vsyncpa [#allocation6 + $0x1], 0  ;;  %s1145_s15 = smov 0   ;;  %s1147_s16 = smov 0  }
   0xc   :  { %s1149_s17 = smov 0   ;;  %s1151_s18 = smov 0  }
   0xd   :  { %s1153_s19 = smov 0   ;;  %s1155_s0 = smov 0  }
   0xe   :  { %s1157_s20 = smov 0  }
   0xf LB: > { %1570 = sst [smem:[#allocation16_spill]] %s1110_s0  ;;  %s1181_s21 = sadd.s32 4294967295, %s1114_s20   ;;  %s1114_s20 = sphi %s1157_s20, %s1602_s20   ;;  %s1110_s0 = sphi %s1155_s0, %s1596_s0   ;;  %s1106_s19 = sphi %s1153_s19, %s1601_s19   ;;  %s1102_s18 = sphi %s1151_s18, %s1600_s18   ;;  %s1098_s17 = sphi %s1149_s17, %s1599_s17   ;;  %s1094_s16 = sphi %s1147_s16, %s1598_s16   ;;  %s1090_s15 = sphi %s1145_s15, %s1597_s15  }
  0x10   : > { %s827_s22 = sadd.s32 4294967294, %s1114_s20   ;;  %s1185_s23 = sadd.s32 1, %s1114_s20  }
  0x11   : > { %s33_s24 = sadd.s32 1, %s1110_s0  ;;  %s30_s25 = ssub.s32 %s1114_s20, %s1185_s23 }
  0x12   : > { %p40_p0 = scmp.ne.s32.totalorder %s1110_s0, %s1106_s19  ;;  %p31_p1 = scmp.eq.s32.totalorder %s30_s25, 0 }
  0x13   : > { %p1563_p2 = scmp.eq.s32.totalorder %s1114_s20, 0  ;;  %p46_p3 = scmp.ne.s32.totalorder %s1106_s19, %s1102_s18 }
  0x14   : > { %p1564_p4 = scmp.eq.s32.totalorder %s1181_s21, 0  ;;  %s1212_s29 = sld [smem:[#allocation3 + %s1185_s23]] }
  0x15   : > { %s1197_s26 = scalar_select %p31_p1, %s1110_s0, %s33_s24  }
  0x16   : > { %p1201_p5 = por %p1563_p2, %p40_p0  ;;  %p1207_p6 = por %p1564_p4, %p46_p3 }
  0x17   : > { %1571 = sst [smem:[#allocation17_spill]] %s1197_s26  ;;  %p98_p7 = scmp.eq.s32.totalorder %s1181_s21, 1 }
  0x18   : > { %s1573_s28 = scalar_select %p1207_p6, 1, 0 }
  0x19   : > { %p104_p8 = scmp.eq.s32.totalorder %s827_s22, 1  ;;  %p1216_p10 = por %p98_p7, %p40_p0 }
  0x1a   : > { %p1562_p11 = scmp.lt.s32.totalorder %s1114_s20, 2  ;;  %s124_s5 = sand.u32 1, %s1110_s0  }
  0x1b   : > { %s1574_s30 = scalar_select %p1216_p10, 1, 0 }
  0x1c   : > { %p1221_p12 = por %p104_p8, %p46_p3  ;;  %s830_s6 = sshll.u32 %s124_s5, 2 }
  0x1d   : > { %s831_s7 = sshll.u32 %s1114_s20, 6  ;;  %s1576_s1 = sld [smem:[#allocation18_spill]] }
  0x1e   : > { %s1575_s4 = scalar_select %p1221_p12, 1, 0 }
  0x1f   : > { %s128_s11 = scalar_lea.vmem [#allocation4], %s830_s6  ;;  %p1238_p13 = pnand %p1562_p11, %p1201_p5 }
  0x20   : > { %s135_s12 = sshll.u32 %s128_s11, 4  ;;  %s125_s14 = scalar_lea.sflag [#allocation5], %s124_s5  ;;  %s1232_s12 = int_to_ptr.vmem [resolvable:$true] %s135_s12 }
  0x21   : > { %p966_p7 = pneg %p1238_p13 }
  0x23   : > { %s1230_s10 = scalar_lea.hbm %s1576_s1, %s831_s7  ;;  %s969_s6 = scalar_lea.hbm %s1576_s1, 128 }
  0x24   : > { %s964_s22 = scalar_lea.hbm %s1230_s10, 64  ;;  %p970_p5 = scmp.lt.s32.totalorder %s1230_s10, %s1576_s1 }
  0x25   : > { %p965_p3 = scmp.ne.s32.totalorder %s1230_s10, %s964_s22  ;;  %p971_p11 = scmp.lt.s32.totalorder %s969_s6, %s964_s22 }
  0x27   : > { %p967_p8 = pnand %p966_p7, %p965_p3  ;;  %p972_p2 = por %p971_p11, %p970_p5 }
  0x29   : > { %p968_p9 = pneg %p967_p8 }
  0x2b   : > { %p973_p4 = pnand %p972_p2, %p968_p9 }
  0x2d   : > { %976 = shalt.err (!%p973_p4)
}
  0x2e   : > { %s977_s5 = scalar_lea.vmem %s1232_s12, 64  ;;  %s1117_s8 = smov [#allocation4]  }
  0x2f   : > { %p978_p0 = scmp.ne.s32.totalorder %s1232_s12, %s977_s5  ;;  %s982_s9 = sshll.u32 %s1117_s8, 4  ;;  %s983_s9 = int_to_ptr.vmem [resolvable:$false] %s982_s9 }
  0x30   : > { %s984_s11 = scalar_lea.vmem %s983_s9, 128  ;;  %p985_p8 = scmp.lt.s32.totalorder %s1232_s12, %s983_s9 }
  0x31   : > { %p980_p1 = pnand %p978_p0, %p966_p7  ;;  %p986_p12 = scmp.lt.s32.totalorder %s984_s11, %s977_s5 }
  0x33   : > { %p981_p3 = pneg %p980_p1  ;;  %p987_p10 = por %p986_p12, %p985_p8 }
  0x35   : > { %p988_p6 = pnand %p987_p10, %p981_p3 }
  0x37   : > { %991 = shalt.err (!%p988_p6)
}
  0x38   : > { %883 = dma.hbm_to_vmem [thread:$0]  (!%p1238_p13), %s1230_s10, 64, %s1232_s12, %s125_s14  }
  0x39   : > { %p1578_p2 = scmp.lt.s32.totalorder %s1114_s20, 3  ;;  %p1579_p4 = scmp.ge.s32.totalorder %s1114_s20, 1 }
  0x3a   : > { %s56_s22 = sld [smem:[#allocation3 + %s1114_s20]]  ;;  %p68_p9 = scmp.ne.s32.totalorder %s1098_s17, %s1094_s16 }
  0x3b   : > { %p1266_p6 = pnand %p1579_p4, %p1578_p2  ;;  %p74_p10 = scmp.ne.s32.totalorder %s1094_s16, %s1090_s15 }
  0x3c   : > { %p1581_p11 = scmp.eq.s32.totalorder %s1181_s21, 0  ;;  %s142_s25 = sand.u32 1, %s1098_s17  }
  0x3d   : > { %s1580_s13 = scalar_select %p1266_p6, 1, 0 }
  0x3e   : > { %p1277_p12 = por %p74_p10, %p1581_p11  ;;  %p1583_p0 = scmp.eq.s32.totalorder %s1114_s20, 0 }
  0x3f   : > { %s61_s10 = sadd.s32 1, %s1098_s17  ;;  %s832_s14 = sshll.u32 %s142_s25, 2 }
  0x40   : > { %s1582_s24 = scalar_select %p1277_p12, 1, 0 }
  0x41   : > { %p70_p1 = por %p68_p9, %p1583_p0  ;;  %s58_s12 = ssub.s32 %s56_s22, %s1212_s29 }
  0x42   : > { %p59_p13 = scmp.eq.s32.totalorder %s58_s12, 0  ;;  %p1584_p7 = scmp.lt.s32.totalorder %s1114_s20, 2 }
  0x43   : > { %s873_s27 = scalar_select %p70_p1, [#allocation3], [#allocation10] }
  0x44   : > { %p1288_p5 = pnand %p1584_p7, %p70_p1  ;;  %p1586_p3 = pmov %p1584_p7 }
  0x45   : > { %s1293_s15 = scalar_select %p59_p13, %s1098_s17, %s61_s10  }
  0x46   : > { %s874_s7 = scalar_select %p70_p1, %s1114_s20, 0 }
  0x47   : > { %s1604_s27 = smov (!%p1586_p3, %s873_s27), [#allocation11]  ;;  %p1587_p8 = pmov %p1586_p3 }
  0x48   : > { %s146_s8 = scalar_lea.vmem [#allocation7], %s832_s14  ;;  %s143_s1 = scalar_lea.sflag [#allocation8], %s142_s25 }
  0x49   : > { %s1606_s7 = smov (!%p1587_p8, %s874_s7), 0  ;;  %s155_s9 = sshll.u32 %s146_s8, 4  ;;  %s1300_s9 = int_to_ptr.vmem [resolvable:$true] %s155_s9 }
  0x4a   : > { %s147_s5 = sld [smem:[%s1604_s27 + %s1606_s7]]  ;;  %p994_p4 = pneg %p1288_p5 }
  0x4b   : > { %s997_s27 = scalar_lea.hbm %s1560_s2, 128 }
  0x50   : > { %s849_s29 = sshll.u32 %s147_s5, 6 }
  0x51   : > { %s153_s12 = scalar_lea.hbm %s1560_s2, %s849_s29 }
  0x52   : > { %s992_s26 = scalar_lea.hbm %s153_s12, 64  ;;  %p998_p11 = scmp.lt.s32.totalorder %s153_s12, %s1560_s2 }
  0x53   : > { %p993_p2 = scmp.ne.s32.totalorder %s153_s12, %s992_s26  ;;  %p999_p0 = scmp.lt.s32.totalorder %s997_s27, %s992_s26 }
  0x55   : > { %p995_p9 = pnand %p994_p4, %p993_p2  ;;  %p1000_p1 = por %p999_p0, %p998_p11 }
  0x57   : > { %p996_p10 = pneg %p995_p9 }
  0x59   : > { %p1001_p13 = pnand %p1000_p1, %p996_p10 }
  0x5b   : > { %1004 = shalt.err (!%p1001_p13)
}
  0x5c   : > { %s1005_s25 = scalar_lea.vmem %s1300_s9, 64  ;;  %s1118_s5 = smov [#allocation7]  }
  0x5d   : > { %p1006_p7 = scmp.ne.s32.totalorder %s1300_s9, %s1005_s25  ;;  %s1010_s8 = sshll.u32 %s1118_s5, 4  ;;  %s1011_s8 = int_to_ptr.vmem [resolvable:$false] %s1010_s8 }
  0x5e   : > { %s1012_s0 = scalar_lea.vmem %s1011_s8, 128  ;;  %p1013_p2 = scmp.lt.s32.totalorder %s1300_s9, %s1011_s8 }
  0x5f   : > { %p1008_p3 = pnand %p1006_p7, %p994_p4  ;;  %p1014_p9 = scmp.lt.s32.totalorder %s1012_s0, %s1005_s25 }
  0x61   : > { %p1009_p8 = pneg %p1008_p3  ;;  %p1015_p12 = por %p1014_p9, %p1013_p2 }
  0x63   : > { %p1016_p6 = pnand %p1015_p12, %p1009_p8 }
  0x65   : > { %1019 = shalt.err (!%p1016_p6)
}
  0x66   : > { %888 = dma.hbm_to_vmem [thread:$0]  (!%p1288_p5), %s153_s12, 64, %s1300_s9, %s143_s1  }
  0x67   : > { %p1588_p10 = scmp.ne.s32.totalorder %s1580_s13, 0 }
  0x68   : > { %s1322_s26 = sand.u32 (!%p1588_p10), 1, %s1106_s19   ;;  %p1589_p12 = scmp.ne.s32.totalorder (!%p1588_p10), %s1573_s28, 0 }
  0x69   : > { %164 = sbr.rel (%p1588_p10) target bundleno = 422 (0x1a6), region = 28  ;;  %s836_s29 = sshll.u32 (!%p1588_p10), %s1322_s26, 2 }
  0x6a   : > { %s167_s11 = scalar_lea.sflag (!%p1588_p10), [#allocation5], %s1322_s26  ;;  %s170_s22 = scalar_lea.vmem (!%p1588_p10), [#allocation4], %s836_s29 }
  0x6e   : > { %1077 = dma.done.wait (%p1589_p12), %s167_s11, 64  }
  0x6f   : > { %1079 = vsyncadd (%p1589_p12), %s167_s11, 4294967232  ;;  %s175_s1 = sand.u32 1, %s1094_s16   ;;  %p1590_p6 = scmp.ne.s32.totalorder %s1582_s24, 0 }
  0x70   : > { %s837_s13 = sshll.u32 %s175_s1, 2  ;;  %s176_s6 = scalar_lea.sflag [#allocation8], %s175_s1 }
  0x71   : > { %s179_s9 = scalar_lea.vmem [#allocation7], %s837_s13 }
  0x72   : > { %1081 = dma.done.wait (%p1590_p6), %s176_s6, 64  }
  0x73   : > { %1083 = vsyncadd (%p1590_p6), %s176_s6, 4294967232  ;;  %v208_v0 = vlaneseq  ;;  %v1119_v2 = vmov 1966171168   ;;  %v207_v4 = vld [vmem:[%s170_s22] sm:$0xf]  ;;  %v1120_v27 = vmov 0.0  }
  0x74   : > { %v428_v3 = vunpack.c.l.s4 %v1119_v2  ;;  %v1337_v5 = vld.sshfl [vmem:[%s179_s9] sm:$0x33 pattern:$0x76325410]  ;;  %v213_v6 = vmul.f32 0.0, %v207_v4  ;;  %v247_v7 = vrot.slane %v207_v4, 2 }
  0x75   : > { %v209_v1 = vshrl.u32 %v208_v0, 7  ;;  %v278_v8 = vmul.f32 2.0, %v207_v4  ;;  %v311_v9 = vmul.f32 3.0, %v207_v4  ;;  %v665_v12 = vcombine.high %v1337_v5, %v1337_v5  ;;  %s846_s28 = sshll.u32 %s1181_s21, 6  ;;  %s204_s24 = scalar_lea.vmem [#allocation9], %s836_s29 }
  0x76   : > { %v429_v11 = vunpack.c.0.s8 %v428_v3  ;;  %v215_v13 = vrot.slane %v213_v6, 2  ;;  %v249_v14 = vadd.f32 %v247_v7, %v207_v4  ;;  %s734_s12 = sshll.u32 %s204_s24, 4  ;;  %s1512_s14 = scalar_lea.hbm %s1561_s3, %s846_s28  ;;  %s735_s12 = int_to_ptr.vmem [resolvable:$true] %s734_s12 }
  0x77   : > { %v210_v10 = vadd.s32 8, %v209_v1  ;;  %v280_v15 = vrot.slane %v278_v8, 2  ;;  %v313_v16 = vrot.slane %v311_v9, 2  ;;  %v1341_v17 = vcvt.s32.f32 %v209_v1  ;;  %700 = vmatprep.mubr.bf16.mxu0 %v665_v12  ;;  %s721_s7 = scalar_lea.sflag [#allocation6], %s1322_s26  ;;  %s1020_s25 = scalar_lea.vmem %s735_s12, 64 }
  0x78   : > { %v1343_v18 = vsub.s32 0, %v209_v1  ;;  %v1345_v19 = vsub.s32 1, %v209_v1  ;;  %v217_v20 = vadd.f32 %v215_v13, %v207_v4  ;;  %vm250_vm0 = vcmp.ge.f32.partialorder %v249_v14, -0.5  ;;  %p1021_p5 = scmp.ne.s32.totalorder %s735_s12, %s1020_s25  ;;  %p1591_p4 = scmp.ne.s32.totalorder %s1574_s30, 0 }
  0x79   : > { %vm251_vm1 = vcmp.le.f32.partialorder %v249_v14, 15.5  ;;  %v255_v21 = vmax.f32 %v249_v14, 0.0  ;;  %v1347_v22 = vcvt.s32.f32 %v210_v10  ;;  %v282_v23 = vadd.f32 %v280_v15, %v207_v4  ;;  %s1121_s21 = smov [#allocation9]  }
  0x7a   : > { %vm252_vm2 = vmand %vm250_vm0, %vm251_vm1  ;;  %v315_v24 = vadd.f32 %v313_v16, %v207_v4  ;;  %v1349_v25 = vsub.s32 %v429_v11, %v209_v1  ;;  %vm218_vm3 = vcmp.ge.f32.partialorder %v217_v20, -0.5  ;;  %vm219_vm4 = vcmp.le.f32.partialorder %v217_v20, 15.5  ;;  %p1022_p11 = pnand %p1021_p5, %p1591_p4  ;;  %s1024_s5 = sshll.u32 %s1121_s21, 4  ;;  %s1025_s5 = int_to_ptr.vmem [resolvable:$false] %s1024_s5 }
  0x7b   : > { %v223_v26 = vmax.f32 %v217_v20, 0.0  ;;  %v1352_v28 = vsel %vm252_vm2, 1.0, %v1120_v27  ;;  %vm220_vm5 = vmand %vm218_vm3, %vm219_vm4  ;;  %v256_v29 = vmin.f32 %v255_v21, 15.0  ;;  %vm283_vm6 = vcmp.ge.f32.partialorder %v282_v23, -0.5  ;;  %s1026_s8 = scalar_lea.vmem %s1025_s5, 128  ;;  %p1027_p1 = scmp.lt.s32.totalorder %s735_s12, %s1025_s5 }
  0x7c   : > { %v1356_v30 = vrot.slane %v1352_v28, %v1343_v18  ;;  %vm284_vm7 = vcmp.le.f32.partialorder %v282_v23, 15.5  ;;  %v1359_v31 = vsel %vm220_vm5, 1.0, %v1120_v27  ;;  %v288_v33 = vmax.f32 %v282_v23, 0.0  ;;  %p1023_p0 = pneg %p1022_p11  ;;  %p1028_p13 = scmp.lt.s32.totalorder %s1026_s8, %s1020_s25 }
  0x7d   : > { %v224_v32 = vmin.f32 %v223_v26, 15.0  ;;  %vm285_vm8 = vmand %vm283_vm6, %vm284_vm7  ;;  %vm316_vm9 = vcmp.ge.f32.partialorder %v315_v24, -0.5  ;;  %v1363_v34 = vrot.slane %v1359_v31, %v1343_v18  ;;  %v1366_v35 = vrot.slane %v256_v29, %v1343_v18 }
  0x7e   : > { %v1369_v36 = vsel %vm285_vm8, 1.0, %v1120_v27  ;;  %vm317_vm10 = vcmp.le.f32.partialorder %v315_v24, 15.5  ;;  %v289_v38 = vmin.f32 %v288_v33, 15.0  ;;  %v321_v40 = vmax.f32 %v315_v24, 0.0  ;;  %p1029_p7 = por %p1028_p13, %p1027_p1 }
  0x7f   : > { %v1372_v37 = vrot.slane %v224_v32, %v1343_v18  ;;  %v1376_v39 = vrot.slane %v1369_v36, %v1343_v18  ;;  %vm318_vm11 = vmand %vm316_vm9, %vm317_vm10  ;;  %v262_v41 = vsub.f32 %v1347_v22, %v1366_v35  ;;  %v347_v43 = vrot.slane %v224_v32, %v1345_v19 }
  0x80   : > { %v1381_v42 = vsel %vm318_vm11, 1.0, %v1120_v27  ;;  %v359_v44 = vrot.slane %v1359_v31, %v1345_v19  ;;  %v1389_v46 = vrot.slane %v289_v38, %v1343_v18  ;;  %v322_v47 = vmin.f32 %v321_v40, 15.0  ;;  %p1030_p3 = pnand %p1029_p7, %p1023_p0 }
  0x81   : > { %v230_v45 = vsub.f32 %v1347_v22, %v1372_v37  ;;  %v1393_v48 = vrot.slane %v1381_v42, %v1343_v18  ;;  %v264_v49 = vand.u32 2147483647, %v262_v41  ;;  %v348_v50 = vsub.f32 %v1341_v17, %v347_v43 }
  0x82   : > { %v349_v51 = vsub.f32 %v1347_v22, %v347_v43  ;;  %v367_v52 = vrot.slane %v256_v29, %v1345_v19  ;;  %v295_v54 = vsub.f32 %v1347_v22, %v1389_v46  ;;  %v1401_v55 = vrot.slane %v322_v47, %v1343_v18 }
  0x83   : > { %v232_v53 = vand.u32 2147483647, %v230_v45  ;;  %v379_v56 = vrot.slane %v1352_v28, %v1345_v19  ;;  %v266_v57 = vsub.f32 1.0, %v264_v49  ;;  %v350_v58 = vand.u32 2147483647, %v348_v50 }
  0x84   : > { %v351_v59 = vand.u32 2147483647, %v349_v51  ;;  %v368_v60 = vsub.f32 %v1341_v17, %v367_v52  ;;  %v297_v62 = vand.u32 2147483647, %v295_v54  ;;  %v328_v63 = vsub.f32 %v1347_v22, %v1401_v55 }
  0x85   : > { %v234_v61 = vsub.f32 1.0, %v232_v53  ;;  %v369_v0 = vsub.f32 %v1347_v22, %v367_v52  ;;  %v268_v1 = vmax.f32 %v266_v57, 0.0  ;;  %v352_v2 = vsub.f32 1.0, %v350_v58 }
  0x86   : > { %v353_v3 = vsub.f32 1.0, %v351_v59  ;;  %v370_v4 = vand.u32 2147483647, %v368_v60  ;;  %v299_v7 = vsub.f32 1.0, %v297_v62  ;;  %v330_v8 = vand.u32 2147483647, %v328_v63 }
  0x87   : > { %v236_v6 = vmax.f32 %v234_v61, 0.0  ;;  %v371_v9 = vand.u32 2147483647, %v369_v0  ;;  %v274_v10 = vmul.f32 %v1356_v30, %v268_v1  ;;  %v354_v11 = vmax.f32 %v352_v2, 0.0 }
  0x88   : > { %v355_v12 = vmax.f32 %v353_v3, 0.0  ;;  %v372_v13 = vsub.f32 1.0, %v370_v4  ;;  %v301_v15 = vmax.f32 %v299_v7, 0.0  ;;  %v332_v16 = vsub.f32 1.0, %v330_v8 }
  0x89   : > { %v242_v14 = vmul.f32 %v1363_v34, %v236_v6  ;;  %v373_v20 = vsub.f32 1.0, %v371_v9  ;;  %v360_v21 = vmul.f32 %v359_v44, %v354_v11  ;;  %v387_v26 = vrot.slane %v289_v38, %v1345_v19 }
  0x8a   : > { %v361_v23 = vmul.f32 %v359_v44, %v355_v12  ;;  %v374_v24 = vmax.f32 %v372_v13, 0.0  ;;  %v307_v32 = vmul.f32 %v1376_v39, %v301_v15  ;;  %v334_v33 = vmax.f32 %v332_v16, 0.0 }
  0x8b   : > { %v276_v29 = vadd.f32 %v274_v10, %v242_v14  ;;  %v375_v40 = vmax.f32 %v373_v20, 0.0  ;;  %v388_v43 = vsub.f32 %v1341_v17, %v387_v26  ;;  %v389_v45 = vsub.f32 %v1347_v22, %v387_v26 }
  0x8c   : > { %v380_v41 = vmul.f32 %v379_v56, %v374_v24  ;;  %v399_v49 = vrot.slane %v1369_v36, %v1345_v19  ;;  %v340_v51 = vmul.f32 %v1393_v48, %v334_v33  ;;  %v407_v52 = vrot.slane %v322_v47, %v1345_v19 }
  0x8d   : > { %v309_v50 = vadd.f32 %v307_v32, %v276_v29  ;;  %v381_v44 = vmul.f32 %v379_v56, %v375_v40  ;;  %v390_v53 = vand.u32 2147483647, %v388_v43  ;;  %v391_v54 = vand.u32 2147483647, %v389_v45 }
  0x8e   : > { %v382_v38 = vadd.f32 %v380_v41, %v360_v21  ;;  %v419_v57 = vrot.slane %v1381_v42, %v1345_v19  ;;  %v408_v60 = vsub.f32 %v1341_v17, %v407_v52  ;;  %v409_v61 = vsub.f32 %v1347_v22, %v407_v52 }
  0x8f   : > { %v342_v58 = vadd.f32 %v340_v51, %v309_v50  ;;  %v383_v59 = vadd.f32 %v381_v44, %v361_v23  ;;  %v392_v62 = vsub.f32 1.0, %v390_v53  ;;  %v393_v63 = vsub.f32 1.0, %v391_v54 }
  0x90   : > { %v229_v0 = vsub.f32 %v1341_v17, %v1372_v37  ;;  %v261_v47 = vsub.f32 %v1341_v17, %v1366_v35  ;;  %v410_v56 = vand.u32 2147483647, %v408_v60  ;;  %v411_v1 = vand.u32 2147483647, %v409_v61 }
  0x91   : > { %v475_v2 = vcombine.high %v342_v58, %v342_v58  ;;  %v294_v19 = vsub.f32 %v1341_v17, %v1389_v46  ;;  %v394_v3 = vmax.f32 %v392_v62, 0.0  ;;  %v395_v4 = vmax.f32 %v393_v63, 0.0 }
  0x92   : > { %v231_v6 = vand.u32 2147483647, %v229_v0  ;;  %v263_v7 = vand.u32 2147483647, %v261_v47  ;;  %v412_v8 = vsub.f32 1.0, %v410_v56  ;;  %v413_v22 = vsub.f32 1.0, %v411_v1 }
  0x93   : > { %v489_v9 = vrot.slane %v475_v2, %v1349_v25  ;;  %v296_v10 = vand.u32 2147483647, %v294_v19  ;;  %v400_v11 = vmul.f32 %v399_v49, %v394_v3  ;;  %v401_v37 = vmul.f32 %v399_v49, %v395_v4 }
  0x94   : > { %v233_v12 = vsub.f32 1.0, %v231_v6  ;;  %v265_v13 = vsub.f32 1.0, %v263_v7  ;;  %v414_v35 = vmax.f32 %v412_v8, 0.0  ;;  %v415_v14 = vmax.f32 %v413_v22, 0.0 }
  0x95   : > { %v491_v15 = vcombine.high %v489_v9, %v489_v9  ;;  %v298_v16 = vsub.f32 1.0, %v296_v10  ;;  %v402_v20 = vadd.f32 %v400_v11, %v382_v38  ;;  %v403_v21 = vadd.f32 %v401_v37, %v383_v59 }
  0x96   : > { %v235_v46 = vmax.f32 %v233_v12, 0.0  ;;  %v267_v23 = vmax.f32 %v265_v13, 0.0  ;;  %v420_v24 = vmul.f32 %v419_v57, %v414_v35  ;;  %v421_v26 = vmul.f32 %v419_v57, %v415_v14 }
  0x97   : > { %v519_v29 = vrot.slane %v491_v15, %v1349_v25  ;;  %v300_v32 = vmax.f32 %v298_v16, 0.0  ;;  %v327_v41 = vsub.f32 %v1341_v17, %v1401_v55  ;;  %v505_v55 = vrot.slane %v489_v9, %v1349_v25 }
  0x98   : > { %v241_v33 = vmul.f32 %v1363_v34, %v235_v46  ;;  %v273_v40 = vmul.f32 %v1356_v30, %v267_v23  ;;  %v1435_v43 = vadd.f32 %v420_v24, %v402_v20  ;;  %v1437_v45 = vadd.f32 %v421_v26, %v403_v21 }
  0x99   : > { %v523_v49 = vcombine.high %v519_v29, %v519_v29  ;;  %v306_v51 = vmul.f32 %v1376_v39, %v300_v32  ;;  %v329_v44 = vand.u32 2147483647, %v327_v41  ;;  %v521_v61 = vcombine.high %v505_v55, %v505_v55 }
  0x9a   : > { %v275_v50 = vadd.f32 %v273_v40, %v241_v33  ;;  %v482_v39 = vrot.slane %v342_v58, %v1349_v25  ;;  %v579_v19 = vrot.slane %v519_v29, %v1343_v18  ;;  %v575_v11 = vrot.slane %v505_v55, %v1343_v18 }
  0x9b   : > { %v587_v52 = vrot.slane %v523_v49, %v1343_v18  ;;  %v331_v38 = vsub.f32 1.0, %v329_v44  ;;  %v583_v56 = vrot.slane %v521_v61, %v1343_v18 }
  0x9c   : > { %v308_v30 = vadd.f32 %v306_v51, %v275_v50  ;;  %v490_v1 = vcombine.high %v482_v39, %v482_v39  ;;  %v630_v9 = vmul.f32 %v579_v19, %v1435_v43  ;;  %v631_v16 = vmul.f32 %v579_v19, %v1437_v45 }
  0x9d   : > { %v634_v53 = vmul.f32 %v587_v52, %v1435_v43  ;;  %v635_v34 = vmul.f32 %v587_v52, %v1437_v45  ;;  %v333_v54 = vmax.f32 %v331_v38, 0.0  ;;  %v632_v58 = vmul.f32 %v583_v56, %v1435_v43 }
  0x9e   : > { %v633_v7 = vmul.f32 %v583_v56, %v1437_v45  ;;  %v512_v8 = vrot.slane %v490_v1, %v1349_v25  ;;  %v498_v21 = vrot.slane %v482_v39, %v1349_v25  ;;  %v628_v23 = vmul.f32 %v575_v11, %v1435_v43 }
  0x9f   : > { %v656_v57 = vpack.c.bf16 %v635_v34, %v634_v53  ;;  %v339_v17 = vmul.f32 %v1393_v48, %v333_v54  ;;  %v654_v41 = vpack.c.bf16 %v631_v16, %v630_v9  ;;  %v629_v49 = vmul.f32 %v575_v11, %v1437_v45 }
  0xa0   : > { %v655_v15 = vpack.c.bf16 %v633_v7, %v632_v58  ;;  %v522_v20 = vcombine.high %v512_v8, %v512_v8  ;;  %v520_v51 = vcombine.high %v498_v21, %v498_v21 }
  0xa1   : > { %850 = vmatprep.subr.bf16.mxu0 %v656_v57  ;;  %v341_v59 = vadd.f32 %v339_v17, %v308_v30  ;;  %v653_v34 = vpack.c.bf16 %v629_v49, %v628_v23 }
  0xa2   : > { %v571_v50 = vrot.slane %v522_v20, %v1343_v18  ;;  %v567_v57 = vrot.slane %v520_v51, %v1343_v18 }
  0xa3   : > { %v426_v60 = vcombine.high %v341_v59, %v341_v59  ;;  %v433_v63 = vrot.slane %v341_v59, %v1349_v25 }
  0xa4   : > { %v626_v30 = vmul.f32 %v571_v50, %v1435_v43  ;;  %v627_v54 = vmul.f32 %v571_v50, %v1437_v45  ;;  %v624_v39 = vmul.f32 %v567_v57, %v1435_v43 }
  0xa5   : > { %v440_v62 = vrot.slane %v426_v60, %v1349_v25  ;;  %v441_v3 = vcombine.high %v433_v63, %v433_v63  ;;  %v449_v26 = vrot.slane %v433_v63, %v1349_v25  ;;  %v563_v63 = vrot.slane %v512_v8, %v1343_v18 }
  0xa6   : > { %v652_v61 = vpack.c.bf16 %v627_v54, %v626_v30 }
  0xa7   : > { %v442_v0 = vcombine.high %v440_v62, %v440_v62  ;;  %v456_v47 = vrot.slane %v440_v62, %v1349_v25  ;;  %v463_v37 = vrot.slane %v441_v3, %v1349_v25  ;;  %v471_v44 = vcombine.high %v449_v26, %v449_v26 }
  0xa8   : > { %v625_v62 = vmul.f32 %v567_v57, %v1437_v45  ;;  %v623_v19 = vmul.f32 %v563_v63, %v1437_v45  ;;  %v559_v3 = vrot.slane %v498_v21, %v1343_v18  ;;  %v527_v7 = vrot.slane %v449_v26, %v1343_v18 }
  0xa9   : > { %v470_v48 = vrot.slane %v442_v0, %v1349_v25  ;;  %v472_v2 = vcombine.high %v456_v47, %v456_v47  ;;  %v543_v24 = vrot.slane %v456_v47, %v1343_v18  ;;  %v473_v40 = vcombine.high %v463_v37, %v463_v37 }
  0xaa   : > { %v535_v60 = vrot.slane %v471_v44, %v1343_v18  ;;  %v531_v1 = vrot.slane %v463_v37, %v1343_v18  ;;  %v621_v9 = vmul.f32 %v559_v3, %v1437_v45  ;;  %v604_v11 = vmul.f32 %v527_v7, %v1435_v43 }
  0xab   : > { %v474_v4 = vcombine.high %v470_v48, %v470_v48  ;;  %v551_v6 = vrot.slane %v472_v2, %v1343_v18  ;;  %v547_v10 = vrot.slane %v470_v48, %v1343_v18  ;;  %v612_v38 = vmul.f32 %v543_v24, %v1435_v43 }
  0xac   : > { %v613_v25 = vmul.f32 %v543_v24, %v1437_v45  ;;  %v539_v53 = vrot.slane %v473_v40, %v1343_v18  ;;  %v608_v47 = vmul.f32 %v535_v60, %v1435_v43  ;;  %v609_v56 = vmul.f32 %v535_v60, %v1437_v45 }
  0xad   : > { %v555_v22 = vrot.slane %v474_v4, %v1343_v18  ;;  %v616_v35 = vmul.f32 %v551_v6, %v1435_v43  ;;  %v617_v14 = vmul.f32 %v551_v6, %v1437_v45  ;;  %v614_v32 = vmul.f32 %v547_v10, %v1435_v43 }
  0xae   : > { %v615_v33 = vmul.f32 %v547_v10, %v1437_v45  ;;  %v645_v17 = vpack.c.bf16 %v613_v25, %v612_v38  ;;  %v610_v55 = vmul.f32 %v539_v53, %v1435_v43  ;;  %v611_v59 = vmul.f32 %v539_v53, %v1437_v45 }
  0xaf   : > { %v618_v12 = vmul.f32 %v555_v22, %v1435_v43  ;;  %v619_v13 = vmul.f32 %v555_v22, %v1437_v45  ;;  %v647_v29 = vpack.c.bf16 %v617_v14, %v616_v35  ;;  %v651_v48 = vpack.c.bf16 %v625_v62, %v624_v39 }
  0xb0   : > { %v646_v52 = vpack.c.bf16 %v615_v33, %v614_v32  ;;  %v644_v0 = vpack.c.bf16 %v611_v59, %v610_v55  ;;  %v622_v2 = vmul.f32 %v563_v63, %v1435_v43  ;;  %v643_v4 = vpack.c.bf16 %v609_v56, %v608_v47 }
  0xb1   : > { %v648_v46 = vpack.c.bf16 %v619_v13, %v618_v12  ;;  %v606_v6 = vmul.f32 %v531_v1, %v1435_v43  ;;  %v607_v58 = vmul.f32 %v531_v1, %v1437_v45  ;;  %v620_v22 = vmul.f32 %v559_v3, %v1435_v43 }
  0xb2   : > { %v650_v8 = vpack.c.bf16 %v623_v19, %v622_v2  ;;  %v605_v37 = vmul.f32 %v527_v7, %v1437_v45  ;;  %v277_v35 = vadd.f32 %v1352_v28, %v1359_v31 }
  0xb3   : > { %851 = vmatpush3.bf16.msra.mxu0 %v648_v46  ;;  %v642_v10 = vpack.c.bf16 %v607_v58, %v606_v6  ;;  %v649_v12 = vpack.c.bf16 %v621_v9, %v620_v22 }
  0xb4   : > { %852 = vmatprep.subr.bf16.mxu0 %v655_v15  ;;  %v641_v13 = vpack.c.bf16 %v605_v37, %v604_v11  ;;  %v310_v14 = vadd.f32 %v1369_v36, %v277_v35 }
  0xb6   : > { %v343_v15 = vadd.f32 %v1381_v42, %v310_v14 }
  0xb7   : > { %853 = vmatpush3.bf16.msra.mxu0 %v647_v29 }
  0xb8   : > { %854 = vmatprep.subr.bf16.mxu0 %v654_v41  ;;  %v637_v43 = vrot.slane %v343_v15, 1 }
  0xba   : > { %v639_v16 = vmul.f32 %v637_v43, %v343_v15 }
  0xbb   : > { %855 = vmatpush3.bf16.msra.mxu0 %v646_v52 }
  0xbc   : > { %856 = vmatprep.subr.bf16.mxu0 %v653_v34  ;;  %vm708_vm12 = vcmp.gt.f32.partialorder %v639_v16, 0.0 }
  0xbd   : > { %v711_v45 = vsel %vm708_vm12, %v639_v16, 1.0  ;;  %v844_v21 = vsel %vm708_vm12, 1.0, %v1120_v27 }
  0xbe   : > { %954 = vrcp.f32 %v711_v45 }
  0xbf   : > { %857 = vmatpush3.bf16.msra.mxu0 %v645_v17 }
  0xc0   : > { %858 = vmatprep.subr.bf16.mxu0 %v652_v61 }
  0xc3   : > { %859 = vmatpush3.bf16.msra.mxu0 %v644_v0 }
  0xc4   : > { %860 = vmatprep.subr.bf16.mxu0 %v651_v48 }
  0xc7   : > { %861 = vmatpush3.bf16.msra.mxu0 %v643_v4 }
  0xc8   : > { %862 = vmatprep.subr.bf16.mxu0 %v650_v8 }
  0xcb   : > { %863 = vmatpush3.bf16.msra.mxu0 %v642_v10  ;;  %v955_v20 = vpop.eup %954 }
  0xcc   : > { %864 = vmatprep.subr.bf16.mxu0 %v649_v12  ;;  %v713_v46 = vmul.f32 %v955_v20, %v844_v21 }
  0xcf   : > { %865 = vmatpush3.bf16.msra.mxu0 %v641_v13 }
  0xd2   : > { %701 = vmatmul.mubr.bf16.vlgmr.msra.gmra.mxu0 %v1337_v5  ;;  %v717_v5 = vrot.slane %v713_v46, %v1343_v18 }
 0x192   : > { %v866_v23 = vpop.f32.mrf.mxu0 }
 0x194   : > { %v867_v24 = vpop.f32.mrf.mxu0 }
 0x195   : > { %v868_v28 = vadd.f32 %v867_v24, %v866_v23 }
 0x196   : > { %v869_v31 = vpop.f32.mrf.mxu0 }
 0x197   : > { %v718_v36 = vmul.f32 %v868_v28, %v717_v5 }
 0x198   : > { %v870_v27 = vpop.f32.mrf.mxu0 }
 0x199   : > { %719 = vst [vmem:[%s204_s24] sm:$0xf] %v718_v36 }
 0x19a   : > { %1033 = shalt.err (!%p1030_p3)
}
 0x19b   : > { %s1034_s0 = scalar_lea.hbm %s1512_s14, 64  ;;  %s1038_s11 = scalar_lea.hbm %s1561_s3, 128 }
 0x19c   : > { %p1035_p8 = scmp.ne.s32.totalorder %s1512_s14, %s1034_s0  ;;  %p1039_p10 = scmp.lt.s32.totalorder %s1512_s14, %s1561_s3 }
 0x19d   : > { %p1040_p12 = scmp.lt.s32.totalorder %s1038_s11, %s1034_s0 }
 0x19e   : > { %p1036_p2 = pnand %p1035_p8, %p1591_p4 }
 0x19f   : > { %p1041_p6 = por %p1040_p12, %p1039_p10 }
 0x1a0   : > { %p1037_p9 = pneg %p1036_p2 }
 0x1a2   : > { %p1042_p5 = pnand %p1041_p6, %p1037_p9 }
 0x1a4   : > { %1045 = shalt.err (!%p1042_p5)
}
 0x1a5   : > { %878 = dma.vmem_to_hbm [thread:$0]  (%p1591_p4), %s735_s12, 64, %s1512_s14, %s721_s7  }
 0x1a6 PF: > { %s746_s13 = sand.u32 1, %s1102_s18   ;;  %p1592_p11 = scmp.ne.s32.totalorder %s1575_s4, 0 }
 0x1a7   : > { %p1593_p0 = scmp.ge.s32.totalorder %s1114_s20, 2  ;;  %s747_s6 = scalar_lea.sflag [#allocation6], %s746_s13 }
 0x1a9   : > { %p890_p1 = pnand %p1593_p0, %p1592_p11 }
 0x1ab   : > { %p891_p13 = pneg %p890_p1 }
 0x1ad   : > { %1085 = dma.done.wait (%p891_p13), %s747_s6, 64  }
 0x1ae   : > { %1087 = vsyncadd (%p891_p13), %s747_s6, 4294967232  ;;  %s1594_s9 = smov %s1293_s15  ;;  %s1595_s30 = sld [smem:[#allocation16_spill]] }
 0x1af   : > { %s1596_s0 = sld [smem:[#allocation17_spill]]  ;;  %p23_p4 = scmp.ge.s32.totalorder %s1185_s23, 4  }
 0x1b0   : > { %s1597_s15 = smov %s1094_s16  ;;  %s1598_s16 = smov %s1098_s17 }
 0x1b1   : > { %s1599_s17 = smov %s1594_s9  ;;  %s1600_s18 = smov %s1106_s19 }
 0x1b2   : > { %s1602_s20 = smov %s1185_s23  ;;  %25 = sbr.rel (!%p23_p4) target bundleno = 15 (0xf), region = 86 }
 0x1b4   : > { %s1601_s19 = smov %s1595_s30 }
 0x1b7   :  { %752 = vsyncpa [#allocation5], 1 }
 0x1b8   :  { %754 = vsyncpa [#allocation5 + $0x1], 1 }
 0x1b9   :  { %755 = vsyncpa [#allocation8], 1 }
 0x1ba   :  { %757 = vsyncpa [#allocation8 + $0x1], 1 }
 0x1bb   :  { %758 = vsyncpa [#allocation6], 1 }
 0x1bc   :  { %760 = vsyncpa [#allocation6 + $0x1], 1 }

</bundles_post_ra>
